<compile_context>
chip_gen: v6e
topology: v6e:2x2x1
jax: 0.10.0
libtpu: 0.0.40
codegen_flags: <defaults>
</compile_context>

<pallas_src>
import numpy as np
import jax
import jax.numpy as jnp
from jax.experimental import pallas as pl
from jax.experimental.pallas import tpu as pltpu

EPS = 1e-5  # nn.BatchNorm2d default eps


def block_kernel(x_ref, w1_ref, g1_ref, be1_ref, w2_ref, g2_ref, be2_ref,
                 sel_ref, selt_ref, out_ref, lhs_ref):
    # x_ref   : (N, H, W*C)     lane-dense NHWC input (also the identity path)
    # w*_ref  : (3*W*C, W*C)    fused block-banded conv weights (K = 3*W*C)
    # g*/be*  : (1, C)          BN gamma / beta
    # sel_ref : (W*C, C)        lane -> channel folding matrix
    # selt_ref: (C, W*C)        channel -> lane broadcast matrix
    # out_ref : (N, H, W*C)
    # lhs_ref : (N, H, 3*W*C)   f32 VMEM scratch: im2col-along-H LHS
    N, H, WC = x_ref.shape
    C = g1_ref.shape[-1]
    NH = N * H
    W = WC // C
    M = NH * W                       # elements per channel for batch statistics
    mdt = w1_ref.dtype               # MXU operand dtype (bf16 fast path / f32)

    def stage_bands(v):
        # im2col along H into the fused-K LHS scratch:
        #   lhs[n, h, dy*WC:(dy+1)*WC] = v[n, h + dy - 1, :]   (0 outside [0, H))
        zrow = jnp.zeros((N, 1, WC), jnp.float32)
        lhs_ref[:, :, WC:2 * WC] = v                              # dy = 1 (center)
        lhs_ref[:, 0:1, 0:WC] = zrow                              # dy = 0 top halo
        lhs_ref[:, 1:H, 0:WC] = v[:, 0:H - 1, :]                  # dy = 0
        lhs_ref[:, 0:H - 1, 2 * WC:3 * WC] = v[:, 1:H, :]         # dy = 2
        lhs_ref[:, H - 1:H, 2 * WC:3 * WC] = zrow                 # dy = 2 bottom halo

    def conv(w_ref):
        # Single lane-dense K = 3*WC MXU matmul; bf16 operands, f32 accumulation.
        # Full-buffer load -> leading-dim collapse is a contiguous (free) reshape.
        xs = lhs_ref[...].reshape(NH, 3 * WC).astype(mdt)
        return jnp.dot(xs, w_ref[...], preferred_element_type=jnp.float32)

    def bn(acc, g, be):
        # Training-mode batch stats, centered two-pass variance, all f32.
        ssum = jnp.sum(acc, axis=0, keepdims=True)                        # (1, WC)
        mean_c = jnp.dot(ssum, sel_ref[...],
                         preferred_element_type=jnp.float32) * (1.0 / M)  # (1, C)
        mean_l = jnp.dot(mean_c, selt_ref[...],
                         preferred_element_type=jnp.float32)              # (1, WC)
        cen = acc - mean_l
        ssq = jnp.sum(cen * cen, axis=0, keepdims=True)                   # (1, WC)
        var_c = jnp.dot(ssq, sel_ref[...],
                        preferred_element_type=jnp.float32) * (1.0 / M)   # (1, C)
        a_c = g * jax.lax.rsqrt(var_c + EPS)                              # (1, C)
        ab_l = jnp.dot(jnp.concatenate([a_c, be], axis=0), selt_ref[...],
                       preferred_element_type=jnp.float32)                # (2, WC)
        return cen * ab_l[0:1, :] + ab_l[1:2, :]

    x = x_ref[...]                                                        # (N, H, WC)

    # conv1 -> bn1 -> relu
    stage_bands(x)
    y = jnp.maximum(bn(conv(w1_ref), g1_ref[...], be1_ref[...]), 0.0)     # (NH, WC)

    # conv2 -> bn2 -> +identity -> relu
    stage_bands(y.reshape(N, H, WC))
    z = bn(conv(w2_ref), g2_ref[...], be2_ref[...]) + x.reshape(NH, WC)
    out_ref[...] = jnp.maximum(z, 0.0).reshape(N, H, WC)


def _banded_weights(w_hwio, W, dtype):
    """(3, 3, Cin, Cout) HWIO -> (3*W*Cin, W*Cout) fused block-banded matrix.

    Folds the horizontal taps (dx) and the implicit zero padding along W; the
    three dy taps are stacked along K so each conv is a single MXU matmul.
    """
    _, _, Cin, Cout = w_hwio.shape
    place = np.zeros((3, W, W), np.float32)          # [dx, w_in, w_out]
    for dx in range(3):
        for wo in range(W):
            wi = wo + dx - 1
            if 0 <= wi < W:
                place[dx, wi, wo] = 1.0
    b = jnp.einsum('xab,yxio->yaibo', jnp.asarray(place), w_hwio)
    return b.reshape(3 * W * Cin, W * Cout).astype(dtype)


def block_forward(x_nchw, params, mxu_dtype=jnp.bfloat16):
    """Pallas forward of Block (training-mode BN).  x_nchw: (N, C, H, W) f32.

    mxu_dtype controls the conv-matmul operand dtype: bf16 (default) is the MXU
    fast path on v5e/v6e/v7x and halves weight DMA bytes; f32 is the
    bit-accurate path.  BN/ReLU math is always f32.
    """
    w1, b1, g1, be1, w2, b2, g2, be2 = params   # conv biases cancel under BN
    x = jnp.transpose(x_nchw, (0, 2, 3, 1))     # NCHW -> NHWC
    N, H, W, C = x.shape
    WC = W * C
    x_dense = x.reshape(N, H, WC)

    wb1 = _banded_weights(w1, W, mxu_dtype)
    wb2 = _banded_weights(w2, W, mxu_dtype)
    sel = jnp.asarray(np.tile(np.eye(C, dtype=np.float32), (W, 1)))   # (W*C, C)
    selt = jnp.asarray(np.tile(np.eye(C, dtype=np.float32), (1, W)))  # (C, W*C)

    itemsize = jnp.dtype(mxu_dtype).itemsize
    # Advisory cost estimate: 2 convs of (N*H, 3*WC) x (3*WC, WC) + BN/ReLU.
    flops = int(2 * (2 * N * H * (3 * WC) * WC) + 12 * N * H * WC)
    bytes_accessed = int(2 * x_dense.size * 4
                         + (wb1.size + wb2.size) * itemsize
                         + (sel.size + selt.size + 4 * C) * 4)
    # VMEM footprint: in/out activations + weights + im2col scratch, plus slack
    # for double-buffered DMAs and compiler temporaries.
    footprint = (2 * x_dense.size * 4
                 + (wb1.size + wb2.size) * itemsize
                 + N * H * 3 * WC * 4
                 + (sel.size + selt.size) * 4)
    vmem_limit = int(max(4 * footprint, 16 * 1024 * 1024))

    vmem = pl.BlockSpec(memory_space=pltpu.MemorySpace.VMEM)
    out = pl.pallas_call(
        block_kernel,
        out_shape=jax.ShapeDtypeStruct((N, H, WC), jnp.float32),
        in_specs=[vmem] * 9,
        out_specs=vmem,
        scratch_shapes=[pltpu.VMEM((N, H, 3 * WC), jnp.float32)],
        cost_estimate=pl.CostEstimate(flops=flops, transcendentals=2 * C,
                                      bytes_accessed=bytes_accessed),
        compiler_params=pltpu.CompilerParams(vmem_limit_bytes=vmem_limit),
        # TODO(synk): for real ResNet shapes (and v7x's 2 TensorCores / 64 MiB
        # VMEM): grid over N with dimension_semantics=("parallel",), a two-pass
        # BN (per-tile sum/sum-sq partials + tiny reduce/apply), and replace the
        # block-banded weights with per-(dy,dx) (tile,C)x(C,C) matmuls once
        # C >= 64 (banded storage/FLOPs scale as (W*C)^2).
    )(x_dense, wb1, g1.reshape(1, -1), be1.reshape(1, -1),
      wb2, g2.reshape(1, -1), be2.reshape(1, -1), sel, selt)

    out = out.reshape(N, H, W, C)
    # TODO(synk): when stacking Blocks, keep the lane-dense NHWC layout between
    # blocks and only transpose NCHW<->NHWC at model edges.
    return jnp.transpose(out, (0, 3, 1, 2))     # NHWC -> NCHW


def block_reference(x_nchw, params, mxu_dtype=jnp.float32):
    """Pure-JAX reference (XLA conv, biases kept).  With mxu_dtype=bf16 the conv
    operands are rounded to bf16 so it mirrors the kernel's MXU numerics."""
    w1, b1, g1, be1, w2, b2, g2, be2 = params
    x = jnp.transpose(x_nchw, (0, 2, 3, 1))

    def rnd(a):
        return a.astype(mxu_dtype).astype(jnp.float32)

    def conv(a, w, b):
        y = jax.lax.conv_general_dilated(
            rnd(a), rnd(w), window_strides=(1, 1), padding='SAME',
            dimension_numbers=('NHWC', 'HWIO', 'NHWC'))
        return y + b.reshape(1, 1, 1, -1)

    def bn(a, g, be):
        m = a.mean(axis=(0, 1, 2), keepdims=True)
        v = ((a - m) ** 2).mean(axis=(0, 1, 2), keepdims=True)
        return (a - m) / jnp.sqrt(v + EPS) * g.reshape(1, 1, 1, -1) + be.reshape(1, 1, 1, -1)

    y = jax.nn.relu(bn(conv(x, w1, b1), g1, be1))
    z = bn(conv(y, w2, b2), g2, be2) + x
    z = jax.nn.relu(z)
    return jnp.transpose(z, (0, 3, 1, 2))


if __name__ == "__main__":
    # Small shapes consistent with the module: batch=2, channels=8, spatial=16
    # (W*C = 128 -> fully lane-dense).
    N, C, H, W = 2, 8, 16, 16
    key = jax.random.PRNGKey(0)
    ks = jax.random.split(key, 9)

    x = jax.random.normal(ks[0], (N, C, H, W), jnp.float32)

    # Deterministic parameter init (shapes from Block.__init__, HWIO weights).
    w1 = 0.1 * jax.random.normal(ks[1], (3, 3, C, C), jnp.float32)
    b1 = 0.1 * jax.random.normal(ks[2], (C,), jnp.float32)
    g1 = 1.0 + 0.1 * jax.random.normal(ks[3], (C,), jnp.float32)
    be1 = 0.1 * jax.random.normal(ks[4], (C,), jnp.float32)
    w2 = 0.1 * jax.random.normal(ks[5], (3, 3, C, C), jnp.float32)
    b2 = 0.1 * jax.random.normal(ks[6], (C,), jnp.float32)
    g2 = 1.0 + 0.1 * jax.random.normal(ks[7], (C,), jnp.float32)
    be2 = 0.1 * jax.random.normal(ks[8], (C,), jnp.float32)
    params = (w1, b1, g1, be1, w2, b2, g2, be2)

    # 1) f32 MXU path vs the f32 XLA reference (tight tolerance).
    out_f32 = jax.block_until_ready(block_forward(x, params, mxu_dtype=jnp.float32))
    ref_f32 = jax.block_until_ready(block_reference(x, params, mxu_dtype=jnp.float32))
    assert out_f32.shape == (N, C, H, W), out_f32.shape
    err32 = float(jnp.max(jnp.abs(out_f32 - ref_f32)))
    assert jnp.allclose(out_f32, ref_f32, atol=5e-4, rtol=5e-4), f"f32 max abs err = {err32}"

    # 2) Default bf16-MXU-operand path (the fast path on v5e/v6e/v7x) vs a
    #    reference with identically bf16-rounded conv operands.
    out_bf16 = jax.block_until_ready(block_forward(x, params))
    ref_bf16 = jax.block_until_ready(block_reference(x, params, mxu_dtype=jnp.bfloat16))
    err16 = float(jnp.max(jnp.abs(out_bf16 - ref_bf16)))
    assert jnp.allclose(out_bf16, ref_bf16, atol=5e-3, rtol=5e-3), f"bf16 max abs err = {err16}"

    print("KERNEL_OK")
</pallas_src>

<mosaic_0001>
module attributes {stable_mosaic.version = 11 : i64} {
  func.func @block_kernel(%arg0: memref<2x16x128xf32, #tpu.memory_space<vmem>>, %arg1: memref<384x128xf32, #tpu.memory_space<vmem>>, %arg2: memref<1x8xf32, #tpu.memory_space<vmem>>, %arg3: memref<1x8xf32, #tpu.memory_space<vmem>>, %arg4: memref<384x128xf32, #tpu.memory_space<vmem>>, %arg5: memref<1x8xf32, #tpu.memory_space<vmem>>, %arg6: memref<1x8xf32, #tpu.memory_space<vmem>>, %arg7: memref<128x8xf32, #tpu.memory_space<vmem>>, %arg8: memref<8x128xf32, #tpu.memory_space<vmem>>, %arg9: memref<2x16x128xf32, #tpu.memory_space<vmem>>, %arg10: memref<2x16x384xf32, #tpu.memory_space<vmem>>) attributes {dimension_semantics = [], scalar_prefetch = 0 : i64, scratch_operands = 1 : i64, tpu.core_type = #tpu.core_type<tc>} {
    %c0 = arith.constant 0 : index
    %c0_0 = arith.constant 0 : index
    %c0_1 = arith.constant 0 : index
    %0 = vector.load %arg0[%c0, %c0_0, %c0_1] : memref<2x16x128xf32, #tpu.memory_space<vmem>>, vector<2x16x128xf32>
    %cst = arith.constant 0.000000e+00 : f32
    %1 = vector.broadcast %cst : f32 to vector<2x1x128xf32>
    %c0_2 = arith.constant 0 : index
    %c0_3 = arith.constant 0 : index
    %c128 = arith.constant 128 : index
    %2 = vector.load %arg10[%c0_2, %c0_3, %c128] : memref<2x16x384xf32, #tpu.memory_space<vmem>>, vector<2x16x128xf32>
    tpu.vector_store %arg10[%c0_2, %c0_3, %c128], %0 {strides = array<i32>} : memref<2x16x384xf32, #tpu.memory_space<vmem>>, vector<2x16x128xf32>,
    %c0_4 = arith.constant 0 : index
    %c0_5 = arith.constant 0 : index
    %c0_6 = arith.constant 0 : index
    %3 = vector.load %arg10[%c0_4, %c0_5, %c0_6] : memref<2x16x384xf32, #tpu.memory_space<vmem>>, vector<2x1x128xf32>
    tpu.vector_store %arg10[%c0_4, %c0_5, %c0_6], %1 {strides = array<i32>} : memref<2x16x384xf32, #tpu.memory_space<vmem>>, vector<2x1x128xf32>,
    %4 = vector.extract_strided_slice %0 {offsets = [0, 0, 0], sizes = [2, 15, 128], strides = [1, 1, 1]} : vector<2x16x128xf32> to vector<2x15x128xf32>
    %c0_7 = arith.constant 0 : index
    %c1 = arith.constant 1 : index
    %c0_8 = arith.constant 0 : index
    %5 = vector.load %arg10[%c0_7, %c1, %c0_8] : memref<2x16x384xf32, #tpu.memory_space<vmem>>, vector<2x15x128xf32>
    tpu.vector_store %arg10[%c0_7, %c1, %c0_8], %4 {strides = array<i32>} : memref<2x16x384xf32, #tpu.memory_space<vmem>>, vector<2x15x128xf32>,
    %6 = vector.extract_strided_slice %0 {offsets = [0, 1, 0], sizes = [2, 15, 128], strides = [1, 1, 1]} : vector<2x16x128xf32> to vector<2x15x128xf32>
    %c0_9 = arith.constant 0 : index
    %c0_10 = arith.constant 0 : index
    %c256 = arith.constant 256 : index
    %7 = vector.load %arg10[%c0_9, %c0_10, %c256] : memref<2x16x384xf32, #tpu.memory_space<vmem>>, vector<2x15x128xf32>
    tpu.vector_store %arg10[%c0_9, %c0_10, %c256], %6 {strides = array<i32>} : memref<2x16x384xf32, #tpu.memory_space<vmem>>, vector<2x15x128xf32>,
    %c0_11 = arith.constant 0 : index
    %c15 = arith.constant 15 : index
    %c256_12 = arith.constant 256 : index
    %8 = vector.load %arg10[%c0_11, %c15, %c256_12] : memref<2x16x384xf32, #tpu.memory_space<vmem>>, vector<2x1x128xf32>
    tpu.vector_store %arg10[%c0_11, %c15, %c256_12], %1 {strides = array<i32>} : memref<2x16x384xf32, #tpu.memory_space<vmem>>, vector<2x1x128xf32>,
    %c0_13 = arith.constant 0 : index
    %c0_14 = arith.constant 0 : index
    %c0_15 = arith.constant 0 : index
    %9 = vector.load %arg10[%c0_13, %c0_14, %c0_15] : memref<2x16x384xf32, #tpu.memory_space<vmem>>, vector<2x16x384xf32>
    %10 = vector.shape_cast %9 : vector<2x16x384xf32> to vector<32x384xf32>
    %c0_16 = arith.constant 0 : index
    %c0_17 = arith.constant 0 : index
    %11 = vector.load %arg1[%c0_16, %c0_17] : memref<384x128xf32, #tpu.memory_space<vmem>>, vector<384x128xf32>
    %cst_18 = arith.constant dense<0.000000e+00> : vector<32x128xf32>
    %12 = tpu.matmul %10, %11, %cst_18 {dimension_numbers = #tpu.dot_dimension_numbers<[1], [0], [0], [1], [0, 0, 1, 1], [], []>} : vector<32x384xf32>, vector<384x128xf32>, vector<32x128xf32> -> vector<32x128xf32>
    %c0_19 = arith.constant 0 : index
    %c0_20 = arith.constant 0 : index
    %13 = vector.load %arg2[%c0_19, %c0_20] : memref<1x8xf32, #tpu.memory_space<vmem>>, vector<1x8xf32>
    %c0_21 = arith.constant 0 : index
    %c0_22 = arith.constant 0 : index
    %14 = vector.load %arg3[%c0_21, %c0_22] : memref<1x8xf32, #tpu.memory_space<vmem>>, vector<1x8xf32>
    %cst_23 = arith.constant dense<0.000000e+00> : vector<128xf32>
    %15 = vector.multi_reduction <add>, %12, %cst_23 [0] : vector<32x128xf32> to vector<128xf32>
    %16 = vector.shape_cast %15 : vector<128xf32> to vector<1x128xf32>
    %c0_24 = arith.constant 0 : index
    %c0_25 = arith.constant 0 : index
    %17 = vector.load %arg7[%c0_24, %c0_25] : memref<128x8xf32, #tpu.memory_space<vmem>>, vector<128x8xf32>
    %cst_26 = arith.constant dense<0.000000e+00> : vector<1x8xf32>
    %18 = tpu.matmul %16, %17, %cst_26 {dimension_numbers = #tpu.dot_dimension_numbers<[1], [0], [0], [1], [0, 0, 1, 1], [], []>} : vector<1x128xf32>, vector<128x8xf32>, vector<1x8xf32> -> vector<1x8xf32>
    %cst_27 = arith.constant 0.001953125 : f32
    %19 = vector.broadcast %cst_27 : f32 to vector<1x8xf32>
    %20 = arith.mulf %18, %19 : vector<1x8xf32>
    %c0_28 = arith.constant 0 : index
    %c0_29 = arith.constant 0 : index
    %21 = vector.load %arg8[%c0_28, %c0_29] : memref<8x128xf32, #tpu.memory_space<vmem>>, vector<8x128xf32>
    %cst_30 = arith.constant dense<0.000000e+00> : vector<1x128xf32>
    %22 = tpu.matmul %20, %21, %cst_30 {dimension_numbers = #tpu.dot_dimension_numbers<[1], [0], [0], [1], [0, 0, 1, 1], [], []>} : vector<1x8xf32>, vector<8x128xf32>, vector<1x128xf32> -> vector<1x128xf32>
    %23 = vector.broadcast %22 : vector<1x128xf32> to vector<32x128xf32>
    %24 = arith.subf %12, %23 : vector<32x128xf32>
    %25 = arith.mulf %24, %24 : vector<32x128xf32>
    %cst_31 = arith.constant dense<0.000000e+00> : vector<128xf32>
    %26 = vector.multi_reduction <add>, %25, %cst_31 [0] : vector<32x128xf32> to vector<128xf32>
    %27 = vector.shape_cast %26 : vector<128xf32> to vector<1x128xf32>
    %c0_32 = arith.constant 0 : index
    %c0_33 = arith.constant 0 : index
    %28 = vector.load %arg7[%c0_32, %c0_33] : memref<128x8xf32, #tpu.memory_space<vmem>>, vector<128x8xf32>
    %cst_34 = arith.constant dense<0.000000e+00> : vector<1x8xf32>
    %29 = tpu.matmul %27, %28, %cst_34 {dimension_numbers = #tpu.dot_dimension_numbers<[1], [0], [0], [1], [0, 0, 1, 1], [], []>} : vector<1x128xf32>, vector<128x8xf32>, vector<1x8xf32> -> vector<1x8xf32>
    %cst_35 = arith.constant 0.001953125 : f32
    %30 = vector.broadcast %cst_35 : f32 to vector<1x8xf32>
    %31 = arith.mulf %29, %30 : vector<1x8xf32>
    %cst_36 = arith.constant 9.99999974E-6 : f32
    %32 = vector.broadcast %cst_36 : f32 to vector<1x8xf32>
    %33 = arith.addf %31, %32 : vector<1x8xf32>
    %34 = math.rsqrt %33 : vector<1x8xf32>
    %35 = arith.mulf %13, %34 : vector<1x8xf32>
    %36 = tpu.concatenate %35, %14 in 0 : vector<1x8xf32>, vector<1x8xf32> -> vector<2x8xf32>
    %c0_37 = arith.constant 0 : index
    %c0_38 = arith.constant 0 : index
    %37 = vector.load %arg8[%c0_37, %c0_38] : memref<8x128xf32, #tpu.memory_space<vmem>>, vector<8x128xf32>
    %cst_39 = arith.constant dense<0.000000e+00> : vector<2x128xf32>
    %38 = tpu.matmul %36, %37, %cst_39 {dimension_numbers = #tpu.dot_dimension_numbers<[1], [0], [0], [1], [0, 0, 1, 1], [], []>} : vector<2x8xf32>, vector<8x128xf32>, vector<2x128xf32> -> vector<2x128xf32>
    %39 = vector.extract_strided_slice %38 {offsets = [0, 0], sizes = [1, 128], strides = [1, 1]} : vector<2x128xf32> to vector<1x128xf32>
    %40 = vector.broadcast %39 : vector<1x128xf32> to vector<32x128xf32>
    %41 = arith.mulf %24, %40 : vector<32x128xf32>
    %42 = vector.extract_strided_slice %38 {offsets = [1, 0], sizes = [1, 128], strides = [1, 1]} : vector<2x128xf32> to vector<1x128xf32>
    %43 = vector.broadcast %42 : vector<1x128xf32> to vector<32x128xf32>
    %44 = arith.addf %41, %43 : vector<32x128xf32>
    %cst_40 = arith.constant 0.000000e+00 : f32
    %45 = vector.broadcast %cst_40 : f32 to vector<32x128xf32>
    %46 = arith.maximumf %44, %45 : vector<32x128xf32>
    %47 = vector.shape_cast %46 : vector<32x128xf32> to vector<2x16x128xf32>
    %cst_41 = arith.constant 0.000000e+00 : f32
    %48 = vector.broadcast %cst_41 : f32 to vector<2x1x128xf32>
    %c0_42 = arith.constant 0 : index
    %c0_43 = arith.constant 0 : index
    %c128_44 = arith.constant 128 : index
    %49 = vector.load %arg10[%c0_42, %c0_43, %c128_44] : memref<2x16x384xf32, #tpu.memory_space<vmem>>, vector<2x16x128xf32>
    tpu.vector_store %arg10[%c0_42, %c0_43, %c128_44], %47 {strides = array<i32>} : memref<2x16x384xf32, #tpu.memory_space<vmem>>, vector<2x16x128xf32>,
    %c0_45 = arith.constant 0 : index
    %c0_46 = arith.constant 0 : index
    %c0_47 = arith.constant 0 : index
    %50 = vector.load %arg10[%c0_45, %c0_46, %c0_47] : memref<2x16x384xf32, #tpu.memory_space<vmem>>, vector<2x1x128xf32>
    tpu.vector_store %arg10[%c0_45, %c0_46, %c0_47], %48 {strides = array<i32>} : memref<2x16x384xf32, #tpu.memory_space<vmem>>, vector<2x1x128xf32>,
    %51 = vector.extract_strided_slice %47 {offsets = [0, 0, 0], sizes = [2, 15, 128], strides = [1, 1, 1]} : vector<2x16x128xf32> to vector<2x15x128xf32>
    %c0_48 = arith.constant 0 : index
    %c1_49 = arith.constant 1 : index
    %c0_50 = arith.constant 0 : index
    %52 = vector.load %arg10[%c0_48, %c1_49, %c0_50] : memref<2x16x384xf32, #tpu.memory_space<vmem>>, vector<2x15x128xf32>
    tpu.vector_store %arg10[%c0_48, %c1_49, %c0_50], %51 {strides = array<i32>} : memref<2x16x384xf32, #tpu.memory_space<vmem>>, vector<2x15x128xf32>,
    %53 = vector.extract_strided_slice %47 {offsets = [0, 1, 0], sizes = [2, 15, 128], strides = [1, 1, 1]} : vector<2x16x128xf32> to vector<2x15x128xf32>
    %c0_51 = arith.constant 0 : index
    %c0_52 = arith.constant 0 : index
    %c256_53 = arith.constant 256 : index
    %54 = vector.load %arg10[%c0_51, %c0_52, %c256_53] : memref<2x16x384xf32, #tpu.memory_space<vmem>>, vector<2x15x128xf32>
    tpu.vector_store %arg10[%c0_51, %c0_52, %c256_53], %53 {strides = array<i32>} : memref<2x16x384xf32, #tpu.memory_space<vmem>>, vector<2x15x128xf32>,
    %c0_54 = arith.constant 0 : index
    %c15_55 = arith.constant 15 : index
    %c256_56 = arith.constant 256 : index
    %55 = vector.load %arg10[%c0_54, %c15_55, %c256_56] : memref<2x16x384xf32, #tpu.memory_space<vmem>>, vector<2x1x128xf32>
    tpu.vector_store %arg10[%c0_54, %c15_55, %c256_56], %48 {strides = array<i32>} : memref<2x16x384xf32, #tpu.memory_space<vmem>>, vector<2x1x128xf32>,
    %c0_57 = arith.constant 0 : index
    %c0_58 = arith.constant 0 : index
    %c0_59 = arith.constant 0 : index
    %56 = vector.load %arg10[%c0_57, %c0_58, %c0_59] : memref<2x16x384xf32, #tpu.memory_space<vmem>>, vector<2x16x384xf32>
    %57 = vector.shape_cast %56 : vector<2x16x384xf32> to vector<32x384xf32>
    %c0_60 = arith.constant 0 : index
    %c0_61 = arith.constant 0 : index
    %58 = vector.load %arg4[%c0_60, %c0_61] : memref<384x128xf32, #tpu.memory_space<vmem>>, vector<384x128xf32>
    %cst_62 = arith.constant dense<0.000000e+00> : vector<32x128xf32>
    %59 = tpu.matmul %57, %58, %cst_62 {dimension_numbers = #tpu.dot_dimension_numbers<[1], [0], [0], [1], [0, 0, 1, 1], [], []>} : vector<32x384xf32>, vector<384x128xf32>, vector<32x128xf32> -> vector<32x128xf32>
    %c0_63 = arith.constant 0 : index
    %c0_64 = arith.constant 0 : index
    %60 = vector.load %arg5[%c0_63, %c0_64] : memref<1x8xf32, #tpu.memory_space<vmem>>, vector<1x8xf32>
    %c0_65 = arith.constant 0 : index
    %c0_66 = arith.constant 0 : index
    %61 = vector.load %arg6[%c0_65, %c0_66] : memref<1x8xf32, #tpu.memory_space<vmem>>, vector<1x8xf32>
    %cst_67 = arith.constant dense<0.000000e+00> : vector<128xf32>
    %62 = vector.multi_reduction <add>, %59, %cst_67 [0] : vector<32x128xf32> to vector<128xf32>
    %63 = vector.shape_cast %62 : vector<128xf32> to vector<1x128xf32>
    %c0_68 = arith.constant 0 : index
    %c0_69 = arith.constant 0 : index
    %64 = vector.load %arg7[%c0_68, %c0_69] : memref<128x8xf32, #tpu.memory_space<vmem>>, vector<128x8xf32>
    %cst_70 = arith.constant dense<0.000000e+00> : vector<1x8xf32>
    %65 = tpu.matmul %63, %64, %cst_70 {dimension_numbers = #tpu.dot_dimension_numbers<[1], [0], [0], [1], [0, 0, 1, 1], [], []>} : vector<1x128xf32>, vector<128x8xf32>, vector<1x8xf32> -> vector<1x8xf32>
    %cst_71 = arith.constant 0.001953125 : f32
    %66 = vector.broadcast %cst_71 : f32 to vector<1x8xf32>
    %67 = arith.mulf %65, %66 : vector<1x8xf32>
    %c0_72 = arith.constant 0 : index
    %c0_73 = arith.constant 0 : index
    %68 = vector.load %arg8[%c0_72, %c0_73] : memref<8x128xf32, #tpu.memory_space<vmem>>, vector<8x128xf32>
    %cst_74 = arith.constant dense<0.000000e+00> : vector<1x128xf32>
    %69 = tpu.matmul %67, %68, %cst_74 {dimension_numbers = #tpu.dot_dimension_numbers<[1], [0], [0], [1], [0, 0, 1, 1], [], []>} : vector<1x8xf32>, vector<8x128xf32>, vector<1x128xf32> -> vector<1x128xf32>
    %70 = vector.broadcast %69 : vector<1x128xf32> to vector<32x128xf32>
    %71 = arith.subf %59, %70 : vector<32x128xf32>
    %72 = arith.mulf %71, %71 : vector<32x128xf32>
    %cst_75 = arith.constant dense<0.000000e+00> : vector<128xf32>
    %73 = vector.multi_reduction <add>, %72, %cst_75 [0] : vector<32x128xf32> to vector<128xf32>
    %74 = vector.shape_cast %73 : vector<128xf32> to vector<1x128xf32>
    %c0_76 = arith.constant 0 : index
    %c0_77 = arith.constant 0 : index
    %75 = vector.load %arg7[%c0_76, %c0_77] : memref<128x8xf32, #tpu.memory_space<vmem>>, vector<128x8xf32>
    %cst_78 = arith.constant dense<0.000000e+00> : vector<1x8xf32>
    %76 = tpu.matmul %74, %75, %cst_78 {dimension_numbers = #tpu.dot_dimension_numbers<[1], [0], [0], [1], [0, 0, 1, 1], [], []>} : vector<1x128xf32>, vector<128x8xf32>, vector<1x8xf32> -> vector<1x8xf32>
    %cst_79 = arith.constant 0.001953125 : f32
    %77 = vector.broadcast %cst_79 : f32 to vector<1x8xf32>
    %78 = arith.mulf %76, %77 : vector<1x8xf32>
    %cst_80 = arith.constant 9.99999974E-6 : f32
    %79 = vector.broadcast %cst_80 : f32 to vector<1x8xf32>
    %80 = arith.addf %78, %79 : vector<1x8xf32>
    %81 = math.rsqrt %80 : vector<1x8xf32>
    %82 = arith.mulf %60, %81 : vector<1x8xf32>
    %83 = tpu.concatenate %82, %61 in 0 : vector<1x8xf32>, vector<1x8xf32> -> vector<2x8xf32>
    %c0_81 = arith.constant 0 : index
    %c0_82 = arith.constant 0 : index
    %84 = vector.load %arg8[%c0_81, %c0_82] : memref<8x128xf32, #tpu.memory_space<vmem>>, vector<8x128xf32>
    %cst_83 = arith.constant dense<0.000000e+00> : vector<2x128xf32>
    %85 = tpu.matmul %83, %84, %cst_83 {dimension_numbers = #tpu.dot_dimension_numbers<[1], [0], [0], [1], [0, 0, 1, 1], [], []>} : vector<2x8xf32>, vector<8x128xf32>, vector<2x128xf32> -> vector<2x128xf32>
    %86 = vector.extract_strided_slice %85 {offsets = [0, 0], sizes = [1, 128], strides = [1, 1]} : vector<2x128xf32> to vector<1x128xf32>
    %87 = vector.broadcast %86 : vector<1x128xf32> to vector<32x128xf32>
    %88 = arith.mulf %71, %87 : vector<32x128xf32>
    %89 = vector.extract_strided_slice %85 {offsets = [1, 0], sizes = [1, 128], strides = [1, 1]} : vector<2x128xf32> to vector<1x128xf32>
    %90 = vector.broadcast %89 : vector<1x128xf32> to vector<32x128xf32>
    %91 = arith.addf %88, %90 : vector<32x128xf32>
    %92 = vector.shape_cast %0 : vector<2x16x128xf32> to vector<32x128xf32>
    %93 = arith.addf %91, %92 : vector<32x128xf32>
    %cst_84 = arith.constant 0.000000e+00 : f32
    %94 = vector.broadcast %cst_84 : f32 to vector<32x128xf32>
    %95 = arith.maximumf %93, %94 : vector<32x128xf32>
    %96 = vector.shape_cast %95 : vector<32x128xf32> to vector<2x16x128xf32>
    %c0_85 = arith.constant 0 : index
    %c0_86 = arith.constant 0 : index
    %c0_87 = arith.constant 0 : index
    %97 = vector.load %arg9[%c0_85, %c0_86, %c0_87] : memref<2x16x128xf32, #tpu.memory_space<vmem>>, vector<2x16x128xf32>
    tpu.vector_store %arg9[%c0_85, %c0_86, %c0_87], %96 {strides = array<i32>} : memref<2x16x128xf32, #tpu.memory_space<vmem>>, vector<2x16x128xf32>,
    return
  }
}

</mosaic_0001>

<bundles_post_ra>
// kernel: tpu_custom_call.1
= control target key start
LH: loop header
LB: loop body
LE: loop exit
PB: predicated region body
PF: predicated region fallthrough
CT: control target
= control target key end

     0   :  { %14 = vsyncpa [#allocation4], 0  ;;  %s2335_s0 = inlined_call_operand.vmem [shape: f32[2,16,128], index: 0, kind: input, shape index: {}]   ;;  %s2336_s1 = inlined_call_operand.hbm [shape: f32[384,128], index: 1, kind: input, shape index: {}]   ;;  %s2337_s2 = inlined_call_operand.vmem [shape: f32[1,8], index: 2, kind: input, shape index: {}]   ;;  %s2338_s3 = inlined_call_operand.vmem [shape: f32[1,8], index: 3, kind: input, shape index: {}]   ;;  %s2339_s4 = inlined_call_operand.hbm [shape: f32[384,128], index: 4, kind: input, shape index: {}]   ;;  %s2340_s5 = inlined_call_operand.vmem [shape: f32[1,8], index: 5, kind: input, shape index: {}]   ;;  %s2341_s6 = inlined_call_operand.vmem [shape: f32[1,8], index: 6, kind: input, shape index: {}]   ;;  %s2342_s7 = inlined_call_operand.vmem [shape: f32[128,8], index: 7, kind: input, shape index: {}]   ;;  %s2343_s8 = inlined_call_operand.vmem [shape: f32[8,128], index: 8, kind: input, shape index: {}]   ;;  %s2344_s9 = inlined_call_operand.hbm [shape: f32[2,16,128], index: 9, kind: output, shape index: {}]  }
   0x1   :  { %15 = vsyncpa [#allocation7], 0 }
   0x2   :  { %16 = vsyncpa [#allocation5], 0  ;;  %s1895_s30 = smov [#allocation3]  }
   0x3   :  { %s24_s10 = sshll.u32 %s1895_s30, 4  ;;  %s25_s10 = int_to_ptr.vmem [resolvable:$true] %s24_s10 }
   0x4   :  { %s1837_s11 = scalar_lea.vmem %s25_s10, 6144  ;;  %p1842_p1 = scmp.lt.s32.totalorder %s25_s10, %s25_s10 }
   0x5   :  { %p1838_p0 = scmp.ne.s32.totalorder %s25_s10, %s1837_s11  ;;  %p1843_p2 = scmp.lt.s32.totalorder %s1837_s11, %s1837_s11 }
   0x7   :  { %p1844_p3 = por %p1843_p2, %p1842_p1 }
   0x9   :  { %p1845_p4 = pnand %p1844_p3, %p1838_p0 }
   0xb   :  { %1848 = shalt.err (!%p1845_p4)
}
   0xc   :  { %s1896_s12 = smov 128   ;;  %s1897_s13 = smov 8  }
   0xd   :  { %30 = dma.hbm_to_vmem [thread:$0]  %s2336_s1, 6144, %s25_s10, [#allocation4], %s1896_s12, %s1896_s12, %s1897_s13  }
   0xe   :  { %s1898_s16 = smov [#allocation6]  }
   0xf   :  { %s40_s17 = sshll.u32 %s1898_s16, 4  ;;  %s41_s17 = int_to_ptr.vmem [resolvable:$true] %s40_s17 }
  0x10   :  { %s1857_s18 = scalar_lea.vmem %s41_s17, 6144  ;;  %p1862_p6 = scmp.lt.s32.totalorder %s41_s17, %s41_s17 }
  0x11   :  { %p1858_p5 = scmp.ne.s32.totalorder %s41_s17, %s1857_s18  ;;  %p1863_p7 = scmp.lt.s32.totalorder %s1857_s18, %s1857_s18 }
  0x13   :  { %p1864_p8 = por %p1863_p7, %p1862_p6 }
  0x15   :  { %p1865_p9 = pnand %p1864_p8, %p1858_p5 }
  0x17   :  { %1868 = shalt.err (!%p1865_p9)
}
  0x18   :  { %46 = dma.hbm_to_vmem [thread:$0]  %s2339_s4, 6144, %s41_s17, [#allocation7], %s1896_s12, %s1896_s12, %s1897_s13  }
  0x19   :  { %1889 = dma.done.wait [#allocation4], 6144  }
  0x1a   :  { %1890 = vsyncadd [#allocation4], 4294961152 }
  0x1b   :  { %1891 = dma.done.wait [#allocation7], 6144  }
  0x1c   :  { %1892 = vsyncadd [#allocation7], 4294961152  ;;  %v1899_v0 = vmov 0.0   ;;  %v150_v1 = vld [vmem:[#allocation3 + $0xf8] sm:$0xff]  ;;  %v149_v3 = vld [vmem:[#allocation3 + $0xf0] sm:$0xff]  ;;  %vm90_vm0 = vcmask 1046528  }
  0x1d   :  { %69 = vst [vmem:[#allocation2] sm:$0x1] %v1899_v0  ;;  %70 = vst [vmem:[#allocation2 + $0x30] sm:$0x1] %v1899_v0  ;;  %v134_v2 = vld [vmem:[#allocation3 + $0x78] sm:$0xff]  ;;  %1374 = vmatprep.subr.mxu0 %v150_v1  ;;  %v133_v5 = vld [vmem:[#allocation3 + $0x70] sm:$0xff] }
  0x1e   :  { %105 = vst [vmem:[#allocation2 + $0x2f] sm:$0x1] %v1899_v0  ;;  %106 = vst [vmem:[#allocation2 + $0x5f] sm:$0x1] %v1899_v0  ;;  %v166_v4 = vld [vmem:[#allocation3 + $0x178] sm:$0xff]  ;;  %1375 = vmatpush3.msra.mxu0 %v134_v2  ;;  %v148_v6 = vld [vmem:[#allocation3 + $0xe8] sm:$0xff] }
  0x1f   :  { %1578 = vmatprep.subr.mxu1 %v166_v4  ;;  %v165_v7 = vld [vmem:[#allocation3 + $0x170] sm:$0xff]  ;;  %1376 = vmatprep.subr.mxu0 %v149_v3  ;;  %v132_v8 = vld [vmem:[#allocation3 + $0x68] sm:$0xff]  ;;  %v147_v10 = vld [vmem:[#allocation3 + $0xe0] sm:$0xff]  ;;  %vm75_vm1 = vcmask 1040384   ;;  %vm1900_vm2 = vmmov 0   ;;  %vm436_vm3 = vcmask 64512  }
  0x20   :  { %1579 = vmatpush3.msra.mxu1 %v166_v4  ;;  %v164_v9 = vld [vmem:[#allocation3 + $0x168] sm:$0xff]  ;;  %1377 = vmatpush3.msra.mxu0 %v133_v5  ;;  %v131_v11 = vld [vmem:[#allocation3 + $0x60] sm:$0xff]  ;;  %v146_v13 = vld [vmem:[#allocation3 + $0xd8] sm:$0xff] }
  0x21   :  { %1580 = vmatprep.subr.mxu1 %v165_v7  ;;  %1378 = vmatprep.subr.mxu0 %v148_v6  ;;  %v163_v12 = vld [vmem:[#allocation3 + $0x160] sm:$0xff]  ;;  %v130_v14 = vld [vmem:[#allocation3 + $0x58] sm:$0xff]  ;;  %v145_v16 = vld [vmem:[#allocation3 + $0xd0] sm:$0xff] }
  0x22   :  { %1581 = vmatpush3.msra.mxu1 %v165_v7  ;;  %1379 = vmatpush3.msra.mxu0 %v132_v8  ;;  %v162_v15 = vld [vmem:[#allocation3 + $0x158] sm:$0xff]  ;;  %v129_v17 = vld [vmem:[#allocation3 + $0x50] sm:$0xff]  ;;  %v144_v19 = vld [vmem:[#allocation3 + $0xc8] sm:$0xff] }
  0x23   :  { %1582 = vmatprep.subr.mxu1 %v164_v9  ;;  %1380 = vmatprep.subr.mxu0 %v147_v10  ;;  %v161_v18 = vld [vmem:[#allocation3 + $0x150] sm:$0xff]  ;;  %v128_v20 = vld [vmem:[#allocation3 + $0x48] sm:$0xff]  ;;  %v143_v22 = vld [vmem:[#allocation3 + $0xc0] sm:$0xff] }
  0x24   :  { %1583 = vmatpush3.msra.mxu1 %v164_v9  ;;  %1381 = vmatpush3.msra.mxu0 %v131_v11  ;;  %v160_v21 = vld [vmem:[#allocation3 + $0x148] sm:$0xff]  ;;  %v127_v23 = vld [vmem:[#allocation3 + $0x40] sm:$0xff]  ;;  %v142_v25 = vld [vmem:[#allocation3 + $0xb8] sm:$0xff] }
  0x25   :  { %1584 = vmatprep.subr.mxu1 %v163_v12  ;;  %1382 = vmatprep.subr.mxu0 %v146_v13  ;;  %v159_v24 = vld [vmem:[#allocation3 + $0x140] sm:$0xff]  ;;  %v126_v26 = vld [vmem:[#allocation3 + $0x38] sm:$0xff]  ;;  %v141_v29 = vld [vmem:[#allocation3 + $0xb0] sm:$0xff] }
  0x26   :  { %1585 = vmatpush3.msra.mxu1 %v163_v12  ;;  %1383 = vmatpush3.msra.mxu0 %v130_v14  ;;  %v158_v27 = vld [vmem:[#allocation3 + $0x138] sm:$0xff]  ;;  %v1971_v28 = vld [vmem:[%s2335_s0] sm:$0xff]  ;;  %v1977_v31 = vld [vmem:[%s2335_s0 + $0x8] sm:$0xff] }
  0x27   :  { %1586 = vmatprep.subr.mxu1 %v162_v15  ;;  %1384 = vmatprep.subr.mxu0 %v145_v16  ;;  %v76_v30 = vrot.slane %v1971_v28, 7  ;;  %v1982_v32 = vld [vmem:[%s2335_s0 + $0x10] sm:$0xff]  ;;  %v92_v35 = vrot.slane %v1977_v31, 1  ;;  %v1989_v37 = vld [vmem:[%s2335_s0 + $0x18] sm:$0xff]  ;;  %v140_v38 = vld [vmem:[#allocation3 + $0xa8] sm:$0xff]  ;;  %v91_v57 = vrot.slane %v1971_v28, 1 }
  0x28   :  { %1587 = vmatpush3.msra.mxu1 %v162_v15  ;;  %1385 = vmatpush3.msra.mxu0 %v129_v17  ;;  %v125_v33 = vld [vmem:[#allocation3 + $0x30] sm:$0xff]  ;;  %v79_v36 = vrot.slane %v1982_v32, 7  ;;  %v95_v39 = vrot.slane %v1989_v37, 1  ;;  %v124_v40 = vld [vmem:[#allocation3 + $0x28] sm:$0xff]  ;;  %v139_v42 = vld [vmem:[#allocation3 + $0xa0] sm:$0xff]  ;;  %v94_v61 = vrot.slane %v1982_v32, 1 }
  0x29   :  { %1588 = vmatprep.subr.mxu1 %v161_v18  ;;  %1386 = vmatprep.subr.mxu0 %v144_v19  ;;  %v157_v34 = vld [vmem:[#allocation3 + $0x130] sm:$0xff]  ;;  %86 = vst [vmem:[#allocation2] sm:$0xfe] %v76_v30  ;;  %v156_v41 = vld [vmem:[#allocation3 + $0x128] sm:$0xff]  ;;  %102 = vst [vmem:[#allocation2 + $0x28] sm:$0x7f] %v92_v35  ;;  %v93_v1 = vsel %vm90_vm0, %v91_v57, %v92_v35 }
  0x2a   :  { %1589 = vmatpush3.msra.mxu1 %v161_v18  ;;  %1387 = vmatpush3.msra.mxu0 %v128_v20  ;;  %88 = vst [vmem:[#allocation2 + $0x30] sm:$0xfe] %v79_v36  ;;  %104 = vst [vmem:[#allocation2 + $0x58] sm:$0x7f] %v95_v39  ;;  %v123_v43 = vld [vmem:[#allocation3 + $0x20] sm:$0xff]  ;;  %v138_v45 = vld [vmem:[#allocation3 + $0x98] sm:$0xff]  ;;  %v96_v2 = vsel %vm90_vm0, %v94_v61, %v95_v39 }
  0x2b   :  { %1590 = vmatprep.subr.mxu1 %v160_v21  ;;  %1388 = vmatprep.subr.mxu0 %v143_v22  ;;  %v155_v44 = vld [vmem:[#allocation3 + $0x120] sm:$0xff]  ;;  %v122_v46 = vld [vmem:[#allocation3 + $0x18] sm:$0xff]  ;;  %v137_v48 = vld [vmem:[#allocation3 + $0x90] sm:$0xff]  ;;  %v77_v63 = vrot.slane %v1977_v31, 7  ;;  %v80_v4 = vrot.slane %v1989_v37, 7 }
  0x2c   :  { %1591 = vmatpush3.msra.mxu1 %v160_v21  ;;  %1389 = vmatpush3.msra.mxu0 %v127_v23  ;;  %v154_v47 = vld [vmem:[#allocation3 + $0x118] sm:$0xff]  ;;  %v121_v49 = vld [vmem:[#allocation3 + $0x10] sm:$0xff]  ;;  %v136_v52 = vld [vmem:[#allocation3 + $0x88] sm:$0xff] }
  0x2d   :  { %1592 = vmatprep.subr.mxu1 %v159_v24  ;;  %1390 = vmatprep.subr.mxu0 %v142_v25  ;;  %v153_v50 = vld [vmem:[#allocation3 + $0x110] sm:$0xff]  ;;  %v120_v55 = vld [vmem:[#allocation3 + $0x8] sm:$0xff]  ;;  %v135_v59 = vld [vmem:[#allocation3 + $0x80] sm:$0xff]  ;;  %v78_v3 = vsel %vm75_vm1, %v76_v30, %v77_v63  ;;  %v81_v5 = vsel %vm75_vm1, %v79_v36, %v80_v4 }
  0x2e   :  { %1593 = vmatpush3.msra.mxu1 %v159_v24  ;;  %1391 = vmatpush3.msra.mxu0 %v126_v26  ;;  %v152_v56 = vld [vmem:[#allocation3 + $0x108] sm:$0xff]  ;;  %v119_v60 = vld [vmem:[#allocation3] sm:$0xff]  ;;  %v2029_v6 = vld [vmem:[%s2342_s7 + $0x78] sm:$0xff] }
  0x2f   :  { %1594 = vmatprep.subr.mxu1 %v158_v27  ;;  %1392 = vmatprep.subr.mxu0 %v141_v29  ;;  %v151_v62 = vld [vmem:[#allocation3 + $0x100] sm:$0xff]  ;;  %v2037_v7 = vld [vmem:[%s2342_s7 + $0x70] sm:$0xff]  ;;  %v2046_v8 = vld [vmem:[%s2342_s7 + $0x68] sm:$0xff] }
  0x30   :  { %1595 = vmatpush3.msra.mxu1 %v158_v27  ;;  %1393 = vmatpush3.msra.mxu0 %v125_v33  ;;  %v107_v51 = vld [vmem:[#allocation2] sm:$0xff]  ;;  %v112_v53 = vld [vmem:[#allocation2 + $0x28] sm:$0xff]  ;;  %v2064_v10 = vld [vmem:[%s2342_s7 + $0x58] sm:$0xff] }
  0x31   :  { %1596 = vmatprep.subr.mxu1 %v157_v34  ;;  %1394 = vmatprep.subr.mxu0 %v140_v38  ;;  %709 = vst [vmem:[#allocation2] sm:$0x1] %v1899_v0  ;;  %v113_v54 = vld [vmem:[#allocation2 + $0x30] sm:$0xff]  ;;  %743 = vst [vmem:[#allocation2 + $0x2f] sm:$0x1] %v1899_v0  ;;  %v118_v58 = vld [vmem:[#allocation2 + $0x58] sm:$0xff] }
  0x32   :  { %1597 = vmatpush3.msra.mxu1 %v157_v34  ;;  %1395 = vmatpush3.msra.mxu0 %v124_v40  ;;  %710 = vst [vmem:[#allocation2 + $0x30] sm:$0x1] %v1899_v0  ;;  %744 = vst [vmem:[#allocation2 + $0x5f] sm:$0x1] %v1899_v0  ;;  %v2055_v9 = vld [vmem:[%s2342_s7 + $0x60] sm:$0xff]  ;;  %v2073_v11 = vld [vmem:[%s2342_s7 + $0x50] sm:$0xff] }
  0x33   :  { %1598 = vmatprep.subr.mxu1 %v156_v41  ;;  %1396 = vmatprep.subr.mxu0 %v139_v42  ;;  %v2082_v12 = vld [vmem:[%s2342_s7 + $0x48] sm:$0xff]  ;;  %v2091_v13 = vld [vmem:[%s2342_s7 + $0x40] sm:$0xff]  ;;  %v2100_v14 = vld [vmem:[%s2342_s7 + $0x38] sm:$0xff] }
  0x34   :  { %1599 = vmatpush3.msra.mxu1 %v156_v41  ;;  %1397 = vmatpush3.msra.mxu0 %v123_v43  ;;  %v2109_v15 = vld [vmem:[%s2342_s7 + $0x30] sm:$0xff]  ;;  %v2118_v16 = vld [vmem:[%s2342_s7 + $0x28] sm:$0xff]  ;;  %v2127_v17 = vld [vmem:[%s2342_s7 + $0x20] sm:$0xff] }
  0x35   :  { %1600 = vmatprep.subr.mxu1 %v155_v44  ;;  %1398 = vmatprep.subr.mxu0 %v138_v45  ;;  %v2136_v18 = vld [vmem:[%s2342_s7 + $0x18] sm:$0xff]  ;;  %v2145_v19 = vld [vmem:[%s2342_s7 + $0x10] sm:$0xff]  ;;  %v2154_v20 = vld [vmem:[%s2342_s7 + $0x8] sm:$0xff] }
  0x36   :  { %1601 = vmatpush3.msra.mxu1 %v155_v44  ;;  %1399 = vmatpush3.msra.mxu0 %v122_v46  ;;  %v2163_v21 = vld [vmem:[%s2342_s7] sm:$0xff] }
  0x37   :  { %1602 = vmatprep.subr.mxu1 %v154_v47  ;;  %1400 = vmatprep.subr.mxu0 %v137_v48 }
  0x38   :  { %1603 = vmatpush3.msra.mxu1 %v154_v47  ;;  %1401 = vmatpush3.msra.mxu0 %v121_v49 }
  0x39   :  { %1604 = vmatprep.subr.mxu1 %v153_v50  ;;  %1402 = vmatprep.subr.mxu0 %v136_v52 }
  0x3a   :  { %1605 = vmatpush3.msra.mxu1 %v153_v50  ;;  %1403 = vmatpush3.msra.mxu0 %v120_v55  ;;  %v510_v55 = vlaneseq }
  0x3b   :  { %1606 = vmatprep.subr.mxu1 %v152_v56  ;;  %1404 = vmatprep.subr.mxu0 %v135_v59 }
  0x3c   :  { %231 = vmatprep.mubr.f32.mxu0 %v1971_v28  ;;  %1405 = vmatpush3.msra.mxu0 %v119_v60 }
  0x3d   :  { %1607 = vmatpush3.msra.mxu1 %v152_v56  ;;  %232 = vmatmul.mubr.f32.vlgmr.msra.gmra.mxu0 %v107_v51  ;;  %v2176_v51 = vld [vmem:[%s2343_s8] sm:$0xff]  ;;  %v2186_v56 = vshrl.u32 %v510_v55, 7  ;;  %v784_v55 = vld [vmem:[#allocation6 + $0xd8] sm:$0xff] }
  0x3e   :  { %1608 = vmatprep.subr.mxu1 %v151_v62  ;;  %1610 = vmatprep.mubr.f32.mxu1 %v93_v1 }
  0x3f   :  { %1609 = vmatpush3.msra.mxu1 %v151_v62  ;;  %236 = vmatprep.mubr.f32.mxu0 %v1977_v31  ;;  %v2189_v57 = vsub.s32 0, %v2186_v56 }
  0x40   :  { %1611 = vmatmul.mubr.f32.vlgmr.msra.gmra.mxu1 %v112_v53  ;;  %1616 = vmatprep.subr.mxu0 %v1899_v0 }
  0x41   :  { %1613 = vmatprep.mubr.f32.mxu1 %v96_v2  ;;  %237 = vmatmul.mubr.f32.gmra.mxu0 %v78_v3 }
  0x42   :  { %1656 = vmatprep.subr.mxu1 %v1899_v0  ;;  %241 = vmatprep.mubr.f32.mxu0 %v1982_v32 }
  0x43   :  { %1617 = vmatpush3.msra.mxu0 %v2029_v6  ;;  %1657 = vmatpush3.msra.mxu1 %v2029_v6 }
  0x44   :  { %1614 = vmatmul.mubr.f32.gmra.mxu1 %v118_v58  ;;  %1618 = vmatprep.subr.mxu0 %v1899_v0 }
  0x45   :  { %242 = vmatmul.mubr.f32.gmra.mxu0 %v113_v54  ;;  %1658 = vmatprep.subr.mxu1 %v1899_v0 }
  0x46   :  { %246 = vmatprep.mubr.f32.mxu0 %v1989_v37  ;;  %1619 = vmatpush3.msra.mxu0 %v2037_v7 }
  0x47   :  { %1659 = vmatpush3.msra.mxu1 %v2037_v7  ;;  %1620 = vmatprep.subr.mxu0 %v1899_v0 }
  0x48   :  { %1660 = vmatprep.subr.mxu1 %v1899_v0  ;;  %1621 = vmatpush3.msra.mxu0 %v2046_v8 }
  0x49   :  { %247 = vmatmul.mubr.f32.gmra.mxu0 %v81_v5  ;;  %1661 = vmatpush3.msra.mxu1 %v2046_v8 }
  0x4a   :  { %1622 = vmatprep.subr.mxu0 %v1899_v0  ;;  %1662 = vmatprep.subr.mxu1 %v1899_v0 }
  0x4b   :  { %1623 = vmatpush3.msra.mxu0 %v2055_v9  ;;  %1663 = vmatpush3.msra.mxu1 %v2055_v9 }
  0x4c   :  { %1624 = vmatprep.subr.mxu0 %v1899_v0  ;;  %1664 = vmatprep.subr.mxu1 %v1899_v0 }
  0x4d   :  { %1625 = vmatpush3.msra.mxu0 %v2064_v10  ;;  %1665 = vmatpush3.msra.mxu1 %v2064_v10 }
  0x4e   :  { %1626 = vmatprep.subr.mxu0 %v1899_v0  ;;  %1666 = vmatprep.subr.mxu1 %v1899_v0 }
  0x4f   :  { %1627 = vmatpush3.msra.mxu0 %v2073_v11  ;;  %1667 = vmatpush3.msra.mxu1 %v2073_v11 }
  0x50   :  { %1628 = vmatprep.subr.mxu0 %v1899_v0  ;;  %1668 = vmatprep.subr.mxu1 %v1899_v0 }
  0x51   :  { %1629 = vmatpush3.msra.mxu0 %v2082_v12  ;;  %1669 = vmatpush3.msra.mxu1 %v2082_v12 }
  0x52   :  { %1630 = vmatprep.subr.mxu0 %v1899_v0  ;;  %1670 = vmatprep.subr.mxu1 %v1899_v0 }
  0x53   :  { %1631 = vmatpush3.msra.mxu0 %v2091_v13  ;;  %1671 = vmatpush3.msra.mxu1 %v2091_v13 }
  0x54   :  { %1632 = vmatprep.subr.mxu0 %v1899_v0  ;;  %1672 = vmatprep.subr.mxu1 %v1899_v0 }
  0x55   :  { %1633 = vmatpush3.msra.mxu0 %v2100_v14  ;;  %1673 = vmatpush3.msra.mxu1 %v2100_v14 }
  0x56   :  { %1634 = vmatprep.subr.mxu0 %v1899_v0  ;;  %1674 = vmatprep.subr.mxu1 %v1899_v0 }
  0x57   :  { %1635 = vmatpush3.msra.mxu0 %v2109_v15  ;;  %1675 = vmatpush3.msra.mxu1 %v2109_v15 }
  0x58   :  { %1636 = vmatprep.subr.mxu0 %v1899_v0  ;;  %1676 = vmatprep.subr.mxu1 %v1899_v0 }
  0x59   :  { %1637 = vmatpush3.msra.mxu0 %v2118_v16  ;;  %1677 = vmatpush3.msra.mxu1 %v2118_v16 }
  0x5a   :  { %1638 = vmatprep.subr.mxu0 %v1899_v0  ;;  %1678 = vmatprep.subr.mxu1 %v1899_v0 }
  0x5b   :  { %1639 = vmatpush3.msra.mxu0 %v2127_v17  ;;  %1679 = vmatpush3.msra.mxu1 %v2127_v17 }
  0x5c   :  { %1640 = vmatprep.subr.mxu0 %v1899_v0  ;;  %1680 = vmatprep.subr.mxu1 %v1899_v0 }
  0x5d   :  { %1641 = vmatpush3.msra.mxu0 %v2136_v18  ;;  %1681 = vmatpush3.msra.mxu1 %v2136_v18 }
  0x5e   :  { %1642 = vmatprep.subr.mxu0 %v1899_v0  ;;  %1682 = vmatprep.subr.mxu1 %v1899_v0 }
  0x5f   :  { %1643 = vmatpush3.msra.mxu0 %v2145_v19  ;;  %1683 = vmatpush3.msra.mxu1 %v2145_v19 }
  0x60   :  { %1644 = vmatprep.subr.mxu0 %v1899_v0  ;;  %1684 = vmatprep.subr.mxu1 %v1899_v0 }
  0x61   :  { %1645 = vmatpush3.msra.mxu0 %v2154_v20  ;;  %1685 = vmatpush3.msra.mxu1 %v2154_v20 }
  0x62   :  { %1646 = vmatprep.subr.mxu0 %v1899_v0  ;;  %1686 = vmatprep.subr.mxu1 %v1899_v0 }
  0x63   :  { %1647 = vmatpush3.msra.mxu0 %v2163_v21  ;;  %1648 = vmatprep.mubr.msk.f32.mxu0 %vm1900_vm2, %v1899_v0 }
  0x64   :  { %1651 = vmatprep.subr.mxu0 %v1899_v0  ;;  %1687 = vmatpush3.msra.mxu1 %v2163_v21 }
  0x65   :  { %1688 = vmatprep.mubr.msk.f32.mxu1 %vm1900_vm2, %v1899_v0 }
  0xfd   :  { %v1406_v22 = vpop.f32.mrf.mxu0 }
  0xff   :  { %v1407_v23 = vpop.f32.mrf.mxu0 }
 0x100   :  { %v1612_v24 = vpop.f32.mrf.mxu1  ;;  %v1408_v31 = vadd.f32 %v1407_v23, %v1406_v22 }
 0x101   :  { %v1409_v25 = vpop.f32.mrf.mxu0 }
 0x102   :  { %v318_v26 = vpop.f32.mrf.mxu1 }
 0x103   :  { %v1410_v27 = vpop.f32.mrf.mxu0  ;;  %v319_v37 = vadd.f32 %v1408_v31, %v318_v26  ;;  %v788_v31 = vld [vmem:[#allocation6 + $0xf8] sm:$0xff] }
 0x104   :  { %v1615_v28 = vpop.f32.mrf.mxu1  ;;  %v1411_v29 = vadd.f32 %v1410_v27, %v1409_v25 }
 0x105   :  { %v1412_v30 = vpop.f32.mrf.mxu0 }
 0x106   :  { %v328_v33 = vpop.f32.mrf.mxu1  ;;  %v324_v34 = vadd.f32 %v1612_v24, %v1411_v29 }
 0x107   :  { %v1413_v32 = vpop.f32.mrf.mxu0 }
 0x108   :  { %v1414_v35 = vadd.f32 %v1413_v32, %v1412_v30  ;;  %v339_v40 = vadd.f32 %v324_v34, %v319_v37  ;;  %v804_v32 = vld [vmem:[#allocation6 + $0x178] sm:$0xff] }
 0x109   :  { %v1415_v36 = vpop.f32.mrf.mxu0  ;;  %1696 = vmatprep.subr.mxu1 %v804_v32 }
 0x10a   :  { %v329_v38 = vadd.f32 %v1414_v35, %v328_v33  ;;  %v803_v33 = vld [vmem:[#allocation6 + $0x170] sm:$0xff]  ;;  %v801_v35 = vld [vmem:[#allocation6 + $0x160] sm:$0xff] }
 0x10b   :  { %v1416_v39 = vpop.f32.mrf.mxu0 }
 0x10c   :  { %v1417_v41 = vadd.f32 %v1416_v39, %v1415_v36  ;;  %v340_v42 = vadd.f32 %v339_v40, %v329_v38  ;;  %v800_v36 = vld [vmem:[#allocation6 + $0x158] sm:$0xff] }
 0x10e   :  { %v334_v43 = vadd.f32 %v1615_v28, %v1417_v41 }
 0x110   :  { %v341_v44 = vadd.f32 %v340_v42, %v334_v43  ;;  %v337_v42 = vld [vmem:[%s2337_s2] sm:$0x1] }
 0x112   :  { %v342_v45 = vrot.slane %v341_v44, 4 }
 0x114   :  { %v343_v46 = vadd.f32 %v342_v45, %v341_v44  ;;  %v1369_v44 = vld [vmem:[%s2338_s3] ss:$0 sm:$0xff] }
 0x116   :  { %v344_v47 = vrot.slane %v343_v46, 2 }
 0x118   :  { %v345_v48 = vadd.f32 %v344_v47, %v343_v46  ;;  %v772_v46 = vld [vmem:[#allocation6 + $0x78] sm:$0xff] }
 0x11a   :  { %v346_v49 = vrot.slane %v345_v48, 1 }
 0x11c   :  { %v347_v50 = vadd.f32 %v346_v49, %v345_v48  ;;  %v787_v48 = vld [vmem:[#allocation6 + $0xf0] sm:$0xff] }
 0x11d   :  { %v771_v49 = vld [vmem:[#allocation6 + $0x70] sm:$0xff] }
 0x11e   :  { %1649 = vmatmul.mubr.f32.vlgmr.msra.gmra.mxu0 %v347_v50  ;;  %v786_v50 = vld [vmem:[#allocation6 + $0xe8] sm:$0xff] }
 0x11f   :  { %1652 = vmatpush3.msra.mxu0 %v2176_v51  ;;  %1653 = vmatprep.mubr.msk.f32.mxu0 %vm1900_vm2, %v1899_v0 }
 0x120   :  { %1691 = vmatprep.subr.mxu0 %v1899_v0 }
 0x1de   :  { %v430_v52 = vpop.f32.mrf.mxu0 }
 0x1df   :  { %v434_v53 = vmul.f32 0.001953125, %v430_v52  ;;  %v770_v52 = vld [vmem:[#allocation6 + $0x68] sm:$0xff] }
 0x1e0   :  { %v1650_v54 = vpop.f32.mrf.mxu0 }
 0x1e1   :  { %1654 = vmatmul.mubr.msk.f32.vlgmr.msra.gmra.mxu0 %vm436_vm3, %v434_v53  ;;  %v785_v53 = vld [vmem:[#allocation6 + $0xe0] sm:$0xff] }
 0x1e2   :  { %1692 = vmatpush3.msra.mxu0 %v2176_v51  ;;  %1693 = vmatprep.mubr.msk.f32.mxu0 %vm1900_vm2, %v1899_v0  ;;  %v769_v54 = vld [vmem:[#allocation6 + $0x60] sm:$0xff] }
 0x1e3   :  { %1476 = vmatprep.subr.mxu0 %v788_v31  ;;  %v794_v31 = vld [vmem:[#allocation6 + $0x128] sm:$0xff] }
 0x2a1   :  { %v506_v58 = vpop.f32.mrf.mxu0 }
 0x2a2   :  { %v513_v59 = vrot.slane %v506_v58, %v2189_v57  ;;  %v768_v58 = vld [vmem:[#allocation6 + $0x58] sm:$0xff] }
 0x2a3   :  { %v1655_v60 = vpop.f32.mrf.mxu0 }
 0x2a4   :  { %v2192_v61 = vsub.f32 %v319_v37, %v513_v59  ;;  %v2194_v62 = vsub.f32 %v324_v34, %v513_v59  ;;  %v2196_v63 = vsub.f32 %v329_v38, %v513_v59  ;;  %v2198_v1 = vsub.f32 %v334_v43, %v513_v59  ;;  %v802_v34 = vld [vmem:[#allocation6 + $0x168] sm:$0xff]  ;;  %v799_v37 = vld [vmem:[#allocation6 + $0x150] sm:$0xff] }
 0x2a5   :  { %v783_v59 = vld [vmem:[#allocation6 + $0xd0] sm:$0xff] }
 0x2a6   :  { %v518_v2 = vmul.f32 %v2192_v61, %v2192_v61  ;;  %v519_v3 = vmul.f32 %v2194_v62, %v2194_v62  ;;  %v520_v4 = vmul.f32 %v2196_v63, %v2196_v63  ;;  %v521_v22 = vmul.f32 %v2198_v1, %v2198_v1  ;;  %v767_v60 = vld [vmem:[#allocation6 + $0x50] sm:$0xff] }
 0x2a8   :  { %v522_v5 = vadd.f32 %v519_v3, %v518_v2  ;;  %v782_v2 = vld [vmem:[#allocation6 + $0xc8] sm:$0xff] }
 0x2a9   :  { %v798_v3 = vld [vmem:[#allocation6 + $0x148] sm:$0xff] }
 0x2aa   :  { %v523_v23 = vadd.f32 %v522_v5, %v520_v4  ;;  %v766_v4 = vld [vmem:[#allocation6 + $0x48] sm:$0xff]  ;;  %v781_v5 = vld [vmem:[#allocation6 + $0xc0] sm:$0xff] }
 0x2ac   :  { %v524_v24 = vadd.f32 %v523_v23, %v521_v22  ;;  %v797_v22 = vld [vmem:[#allocation6 + $0x140] sm:$0xff] }
 0x2ad   :  { %v765_v23 = vld [vmem:[#allocation6 + $0x40] sm:$0xff] }
 0x2ae   :  { %v525_v25 = vrot.slane %v524_v24, 4 }
 0x2b0   :  { %v526_v26 = vadd.f32 %v525_v25, %v524_v24  ;;  %v780_v24 = vld [vmem:[#allocation6 + $0xb8] sm:$0xff] }
 0x2b1   :  { %v796_v25 = vld [vmem:[#allocation6 + $0x138] sm:$0xff] }
 0x2b2   :  { %v527_v27 = vrot.slane %v526_v26, 2 }
 0x2b4   :  { %v528_v28 = vadd.f32 %v527_v27, %v526_v26  ;;  %v764_v26 = vld [vmem:[#allocation6 + $0x38] sm:$0xff]  ;;  %v779_v27 = vld [vmem:[#allocation6 + $0xb0] sm:$0xff] }
 0x2b6   :  { %v529_v29 = vrot.slane %v528_v28, 1 }
 0x2b8   :  { %v530_v30 = vadd.f32 %v529_v29, %v528_v28  ;;  %v795_v28 = vld [vmem:[#allocation6 + $0x130] sm:$0xff] }
 0x2b9   :  { %v763_v29 = vld [vmem:[#allocation6 + $0x30] sm:$0xff] }
 0x2ba   :  { %1689 = vmatmul.mubr.f32.vlgmr.msra.gmra.mxu1 %v530_v30  ;;  %v778_v30 = vld [vmem:[#allocation6 + $0xa8] sm:$0xff] }
 0x2bb   :  { %1697 = vmatpush3.msra.mxu1 %v804_v32  ;;  %v762_v32 = vld [vmem:[#allocation6 + $0x28] sm:$0xff] }
 0x2bc   :  { %1698 = vmatprep.subr.mxu1 %v803_v33 }
 0x2bd   :  { %1699 = vmatpush3.msra.mxu1 %v803_v33  ;;  %v777_v33 = vld [vmem:[#allocation6 + $0xa0] sm:$0xff] }
 0x2be   :  { %1700 = vmatprep.subr.mxu1 %v802_v34 }
 0x2bf   :  { %1701 = vmatpush3.msra.mxu1 %v802_v34  ;;  %v793_v34 = vld [vmem:[#allocation6 + $0x120] sm:$0xff] }
 0x2c0   :  { %1702 = vmatprep.subr.mxu1 %v801_v35 }
 0x2c1   :  { %1703 = vmatpush3.msra.mxu1 %v801_v35  ;;  %v761_v35 = vld [vmem:[#allocation6 + $0x20] sm:$0xff] }
 0x2c2   :  { %1704 = vmatprep.subr.mxu1 %v800_v36 }
 0x2c3   :  { %1705 = vmatpush3.msra.mxu1 %v800_v36  ;;  %v776_v36 = vld [vmem:[#allocation6 + $0x98] sm:$0xff] }
 0x2c4   :  { %1706 = vmatprep.subr.mxu1 %v799_v37 }
 0x2c5   :  { %1707 = vmatpush3.msra.mxu1 %v799_v37  ;;  %v792_v37 = vld [vmem:[#allocation6 + $0x118] sm:$0xff] }
 0x2c6   :  { %1708 = vmatprep.subr.mxu1 %v798_v3 }
 0x2c7   :  { %1709 = vmatpush3.msra.mxu1 %v798_v3 }
 0x2c8   :  { %1710 = vmatprep.subr.mxu1 %v797_v22 }
 0x2c9   :  { %1711 = vmatpush3.msra.mxu1 %v797_v22 }
 0x2ca   :  { %1712 = vmatprep.subr.mxu1 %v796_v25 }
 0x2cb   :  { %1713 = vmatpush3.msra.mxu1 %v796_v25 }
 0x2cc   :  { %1714 = vmatprep.subr.mxu1 %v795_v28 }
 0x2cd   :  { %1715 = vmatpush3.msra.mxu1 %v795_v28 }
 0x2ce   :  { %1716 = vmatprep.subr.mxu1 %v794_v31 }
 0x2cf   :  { %1717 = vmatpush3.msra.mxu1 %v794_v31 }
 0x2d0   :  { %1718 = vmatprep.subr.mxu1 %v793_v34 }
 0x2d1   :  { %1719 = vmatpush3.msra.mxu1 %v793_v34 }
 0x2d2   :  { %1720 = vmatprep.subr.mxu1 %v792_v37 }
 0x2d3   :  { %1721 = vmatpush3.msra.mxu1 %v792_v37 }
 0x37a   :  { %v597_v38 = vpop.f32.mrf.mxu1 }
 0x37b   :  { %v601_v39 = vmul.f32 0.001953125, %v597_v38  ;;  %v760_v38 = vld [vmem:[#allocation6 + $0x18] sm:$0xff] }
 0x37c   :  { %v1690_v40 = vpop.f32.mrf.mxu1 }
 0x37d   :  { %v602_v41 = vadd.f32 1e-05, %v601_v39  ;;  %v775_v39 = vld [vmem:[#allocation6 + $0x90] sm:$0xff] }
 0x37e   :  { %v759_v40 = vld [vmem:[#allocation6 + $0x10] sm:$0xff] }
 0x37f   :  { %1821 = vrsqrt.f32 %v602_v41  ;;  %v774_v41 = vld [vmem:[#allocation6 + $0x88] sm:$0xff] }
 0x38c   :  { %v1822_v43 = vpop.eup %1821 }
 0x38d   :  { %v604_v45 = vmul.f32 %v1822_v43, %v337_v42  ;;  %v791_v42 = vld [vmem:[#allocation6 + $0x110] sm:$0xff]  ;;  %v758_v43 = vld [vmem:[#allocation6 + $0x8] sm:$0xff] }
 0x38e   :  { %1722 = vmatprep.subr.mxu1 %v791_v42 }
 0x38f   :  { %v611_v47 = vsel %vm75_vm1, %v604_v45, %v1369_v44  ;;  %v773_v44 = vld [vmem:[#allocation6 + $0x80] sm:$0xff]  ;;  %v790_v45 = vld [vmem:[#allocation6 + $0x108] sm:$0xff]  ;;  %1723 = vmatpush3.msra.mxu1 %v791_v42 }
 0x390   :  { %1694 = vmatmul.mubr.msk.f32.vlgmr.msra.gmra.mxu0 %vm436_vm3, %v611_v47  ;;  %1724 = vmatprep.subr.mxu1 %v790_v45  ;;  %v789_v47 = vld [vmem:[#allocation6 + $0x100] sm:$0xff] }
 0x391   :  { %1477 = vmatpush3.msra.mxu0 %v772_v46  ;;  %v757_v46 = vld [vmem:[#allocation6] sm:$0xff]  ;;  %1725 = vmatpush3.msra.mxu1 %v790_v45 }
 0x392   :  { %1478 = vmatprep.subr.mxu0 %v787_v48  ;;  %1726 = vmatprep.subr.mxu1 %v789_v47  ;;  %v695_v48 = vsub.s32 1, %v2186_v56  ;;  %v1826_v56 = vld [vmem:[%s2335_s0 + $0x8] sm:$0xff] }
 0x393   :  { %1479 = vmatpush3.msra.mxu0 %v771_v49  ;;  %1727 = vmatpush3.msra.mxu1 %v789_v47 }
 0x394   :  { %1480 = vmatprep.subr.mxu0 %v786_v50  ;;  %1769 = vmatprep.subr.mxu1 %v1899_v0 }
 0x395   :  { %1481 = vmatpush3.msra.mxu0 %v770_v52 }
 0x396   :  { %1482 = vmatprep.subr.mxu0 %v785_v53 }
 0x397   :  { %1483 = vmatpush3.msra.mxu0 %v769_v54 }
 0x398   :  { %1484 = vmatprep.subr.mxu0 %v784_v55 }
 0x399   :  { %1485 = vmatpush3.msra.mxu0 %v768_v58 }
 0x39a   :  { %1486 = vmatprep.subr.mxu0 %v783_v59 }
 0x39b   :  { %1487 = vmatpush3.msra.mxu0 %v767_v60 }
 0x39c   :  { %1488 = vmatprep.subr.mxu0 %v782_v2 }
 0x39d   :  { %1489 = vmatpush3.msra.mxu0 %v766_v4 }
 0x39e   :  { %1490 = vmatprep.subr.mxu0 %v781_v5 }
 0x39f   :  { %1491 = vmatpush3.msra.mxu0 %v765_v23 }
 0x3a0   :  { %1492 = vmatprep.subr.mxu0 %v780_v24 }
 0x3a1   :  { %1493 = vmatpush3.msra.mxu0 %v764_v26 }
 0x3a2   :  { %1494 = vmatprep.subr.mxu0 %v779_v27 }
 0x3a3   :  { %1495 = vmatpush3.msra.mxu0 %v763_v29 }
 0x3a4   :  { %1496 = vmatprep.subr.mxu0 %v778_v30 }
 0x3a5   :  { %1497 = vmatpush3.msra.mxu0 %v762_v32 }
 0x3a6   :  { %1498 = vmatprep.subr.mxu0 %v777_v33 }
 0x3a7   :  { %1499 = vmatpush3.msra.mxu0 %v761_v35 }
 0x3a8   :  { %1500 = vmatprep.subr.mxu0 %v776_v36 }
 0x3a9   :  { %1501 = vmatpush3.msra.mxu0 %v760_v38 }
 0x3aa   :  { %1502 = vmatprep.subr.mxu0 %v775_v39 }
 0x3ab   :  { %1503 = vmatpush3.msra.mxu0 %v759_v40 }
 0x3ac   :  { %1504 = vmatprep.subr.mxu0 %v774_v41 }
 0x3ad   :  { %1505 = vmatpush3.msra.mxu0 %v758_v43 }
 0x3ae   :  { %1506 = vmatprep.subr.mxu0 %v773_v44 }
 0x3af   :  { %1507 = vmatpush3.msra.mxu0 %v757_v46 }
 0x3b0   :  { %1734 = vmatprep.subr.mxu0 %v1899_v0 }
 0x450   :  { %v681_v49 = vpop.f32.mrf.mxu0 }
 0x451   :  { %v688_v50 = vrot.slane %v681_v49, %v2189_v57  ;;  %v696_v52 = vrot.slane %v681_v49, %v695_v48 }
 0x452   :  { %v1695_v53 = vpop.f32.mrf.mxu0 }
 0x453   :  { %v689_v54 = vmul.f32 %v688_v50, %v2192_v61  ;;  %v690_v55 = vmul.f32 %v688_v50, %v2194_v62  ;;  %v691_v58 = vmul.f32 %v688_v50, %v2196_v63  ;;  %v692_v59 = vmul.f32 %v688_v50, %v2198_v1 }
 0x455   :  { %v697_v60 = vadd.f32 %v696_v52, %v689_v54  ;;  %v698_v2 = vadd.f32 %v696_v52, %v690_v55  ;;  %v699_v3 = vadd.f32 %v696_v52, %v691_v58  ;;  %v700_v4 = vadd.f32 %v696_v52, %v692_v59 }
 0x457   :  { %v701_v5 = vmax.f32 %v697_v60, 0.0  ;;  %v702_v22 = vmax.f32 %v698_v2, 0.0  ;;  %v703_v23 = vmax.f32 %v699_v3, 0.0  ;;  %v704_v24 = vmax.f32 %v700_v4, 0.0 }
 0x459   :  { %v715_v25 = vrot.slane %v701_v5, 7  ;;  %v716_v26 = vrot.slane %v702_v22, 7  ;;  %v718_v27 = vrot.slane %v703_v23, 7  ;;  %v719_v28 = vrot.slane %v704_v24, 7  ;;  %869 = vmatprep.mubr.f32.mxu0 %v701_v5 }
 0x45a   :  { %v729_v61 = vrot.slane %v701_v5, 1  ;;  %v730_v29 = vrot.slane %v702_v22, 1  ;;  %v732_v62 = vrot.slane %v703_v23, 1  ;;  %v733_v30 = vrot.slane %v704_v24, 1 }
 0x45b   :  { %v717_v63 = vsel %vm75_vm1, %v715_v25, %v716_v26  ;;  %v720_v1 = vsel %vm75_vm1, %v718_v27, %v719_v28  ;;  %725 = vst [vmem:[#allocation2] sm:$0xfe] %v715_v25  ;;  %727 = vst [vmem:[#allocation2 + $0x30] sm:$0xfe] %v718_v27 }
 0x45c   :  { %v731_v31 = vsel %vm90_vm0, %v729_v61, %v730_v29  ;;  %v734_v32 = vsel %vm90_vm0, %v732_v62, %v733_v30  ;;  %740 = vst [vmem:[#allocation2 + $0x28] sm:$0x7f] %v730_v29  ;;  %742 = vst [vmem:[#allocation2 + $0x58] sm:$0x7f] %v733_v30 }
 0x45d   :  { %1728 = vmatprep.mubr.f32.mxu1 %v731_v31 }
 0x462   :  { %v745_v33 = vld [vmem:[#allocation2] sm:$0xff]  ;;  %v751_v36 = vld [vmem:[#allocation2 + $0x30] sm:$0xff] }
 0x463   :  { %870 = vmatmul.mubr.f32.vlgmr.msra.gmra.mxu0 %v745_v33  ;;  %v750_v34 = vld [vmem:[#allocation2 + $0x28] sm:$0xff]  ;;  %v756_v35 = vld [vmem:[#allocation2 + $0x58] sm:$0xff] }
 0x464   :  { %874 = vmatprep.mubr.f32.mxu0 %v702_v22  ;;  %1729 = vmatmul.mubr.f32.vlgmr.msra.gmra.mxu1 %v750_v34  ;;  %v1372_v34 = vld [vmem:[%s2341_s6] ss:$0 sm:$0xff] }
 0x465   :  { %1731 = vmatprep.mubr.f32.mxu1 %v734_v32  ;;  %1735 = vmatpush3.msra.mxu0 %v2029_v6  ;;  %v975_v32 = vld [vmem:[%s2340_s5] sm:$0x1]  ;;  %s1901_s5 = smov [#allocation8]  }
 0x466   :  { %1736 = vmatprep.subr.mxu0 %v1899_v0  ;;  %1770 = vmatpush3.msra.mxu1 %v2176_v51  ;;  %s1355_s6 = sshll.u32 %s1901_s5, 4  ;;  %s1356_s6 = int_to_ptr.vmem [resolvable:$true] %s1355_s6 }
 0x467   :  { %875 = vmatmul.mubr.f32.gmra.mxu0 %v717_v63  ;;  %1774 = vmatprep.subr.mxu1 %v1899_v0  ;;  %s1869_s10 = scalar_lea.vmem %s1356_s6, 512  ;;  %p1874_p11 = scmp.lt.s32.totalorder %s1356_s6, %s1356_s6 }
 0x468   :  { %879 = vmatprep.mubr.f32.mxu0 %v703_v23  ;;  %1732 = vmatmul.mubr.f32.gmra.mxu1 %v756_v35  ;;  %p1870_p10 = scmp.ne.s32.totalorder %s1356_s6, %s1869_s10  ;;  %p1875_p12 = scmp.lt.s32.totalorder %s1869_s10, %s1869_s10 }
 0x469   :  { %1737 = vmatpush3.msra.mxu0 %v2037_v7  ;;  %1771 = vmatprep.mubr.msk.f32.mxu1 %vm1900_vm2, %v1899_v0 }
 0x46a   :  { %1738 = vmatprep.subr.mxu0 %v1899_v0  ;;  %p1876_p13 = por %p1875_p12, %p1874_p11 }
 0x46b   :  { %880 = vmatmul.mubr.f32.gmra.mxu0 %v751_v36 }
 0x46c   :  { %884 = vmatprep.mubr.f32.mxu0 %v704_v24  ;;  %1739 = vmatpush3.msra.mxu0 %v2046_v8  ;;  %p1877_p0 = pnand %p1876_p13, %p1870_p10 }
 0x46d   :  { %1740 = vmatprep.subr.mxu0 %v1899_v0 }
 0x46e   :  { %1741 = vmatpush3.msra.mxu0 %v2055_v9 }
 0x46f   :  { %885 = vmatmul.mubr.f32.gmra.mxu0 %v720_v1  ;;  %1742 = vmatprep.subr.mxu0 %v1899_v0 }
 0x470   :  { %1743 = vmatpush3.msra.mxu0 %v2064_v10  ;;  %1766 = vmatprep.mubr.msk.f32.mxu0 %vm1900_vm2, %v1899_v0 }
 0x471   :  { %1744 = vmatprep.subr.mxu0 %v1899_v0 }
 0x472   :  { %1745 = vmatpush3.msra.mxu0 %v2073_v11 }
 0x473   :  { %1746 = vmatprep.subr.mxu0 %v1899_v0 }
 0x474   :  { %1747 = vmatpush3.msra.mxu0 %v2082_v12 }
 0x475   :  { %1748 = vmatprep.subr.mxu0 %v1899_v0 }
 0x476   :  { %1749 = vmatpush3.msra.mxu0 %v2091_v13 }
 0x477   :  { %1750 = vmatprep.subr.mxu0 %v1899_v0 }
 0x478   :  { %1751 = vmatpush3.msra.mxu0 %v2100_v14 }
 0x479   :  { %1752 = vmatprep.subr.mxu0 %v1899_v0 }
 0x47a   :  { %1753 = vmatpush3.msra.mxu0 %v2109_v15 }
 0x47b   :  { %1754 = vmatprep.subr.mxu0 %v1899_v0 }
 0x47c   :  { %1755 = vmatpush3.msra.mxu0 %v2118_v16 }
 0x47d   :  { %1756 = vmatprep.subr.mxu0 %v1899_v0 }
 0x47e   :  { %1757 = vmatpush3.msra.mxu0 %v2127_v17 }
 0x47f   :  { %1758 = vmatprep.subr.mxu0 %v1899_v0 }
 0x480   :  { %1759 = vmatpush3.msra.mxu0 %v2136_v18 }
 0x481   :  { %1760 = vmatprep.subr.mxu0 %v1899_v0 }
 0x482   :  { %1761 = vmatpush3.msra.mxu0 %v2145_v19 }
 0x483   :  { %1762 = vmatprep.subr.mxu0 %v1899_v0 }
 0x484   :  { %1763 = vmatpush3.msra.mxu0 %v2154_v20 }
 0x485   :  { %1764 = vmatprep.subr.mxu0 %v1899_v0 }
 0x486   :  { %1765 = vmatpush3.msra.mxu0 %v2163_v21 }
 0x487   :  { %1809 = vmatprep.subr.mxu0 %v1899_v0 }
 0x523   :  { %v1508_v37 = vpop.f32.mrf.mxu0 }
 0x524   :  { %v1730_v38 = vpop.f32.mrf.mxu1 }
 0x525   :  { %v1509_v39 = vpop.f32.mrf.mxu0 }
 0x526   :  { %v956_v41 = vpop.f32.mrf.mxu1  ;;  %v1510_v46 = vadd.f32 %v1509_v39, %v1508_v37 }
 0x527   :  { %v1511_v40 = vpop.f32.mrf.mxu0 }
 0x528   :  { %v1733_v44 = vpop.f32.mrf.mxu1  ;;  %v957_v54 = vadd.f32 %v1510_v46, %v956_v41 }
 0x529   :  { %v1512_v42 = vpop.f32.mrf.mxu0 }
 0x52a   :  { %v1513_v43 = vadd.f32 %v1512_v42, %v1511_v40  ;;  %v966_v52 = vpop.f32.mrf.mxu1 }
 0x52b   :  { %v1514_v45 = vpop.f32.mrf.mxu0 }
 0x52c   :  { %v962_v49 = vadd.f32 %v1730_v38, %v1513_v43 }
 0x52d   :  { %v1515_v47 = vpop.f32.mrf.mxu0 }
 0x52e   :  { %v1516_v50 = vadd.f32 %v1515_v47, %v1514_v45  ;;  %v977_v59 = vadd.f32 %v962_v49, %v957_v54 }
 0x52f   :  { %v1517_v53 = vpop.f32.mrf.mxu0 }
 0x530   :  { %v967_v55 = vadd.f32 %v1516_v50, %v966_v52  ;;  %v1825_v50 = vld [vmem:[%s2335_s0] sm:$0xff] }
 0x531   :  { %v1518_v58 = vpop.f32.mrf.mxu0 }
 0x532   :  { %v1519_v60 = vadd.f32 %v1518_v58, %v1517_v53  ;;  %v978_v2 = vadd.f32 %v977_v59, %v967_v55 }
 0x534   :  { %v972_v3 = vadd.f32 %v1733_v44, %v1519_v60 }
 0x536   :  { %v979_v4 = vadd.f32 %v978_v2, %v972_v3 }
 0x538   :  { %v980_v5 = vrot.slane %v979_v4, 4 }
 0x53a   :  { %v981_v22 = vadd.f32 %v980_v5, %v979_v4 }
 0x53c   :  { %v982_v23 = vrot.slane %v981_v22, 2 }
 0x53e   :  { %v983_v24 = vadd.f32 %v982_v23, %v981_v22 }
 0x540   :  { %v984_v25 = vrot.slane %v983_v24, 1 }
 0x542   :  { %v985_v26 = vadd.f32 %v984_v25, %v983_v24 }
 0x544   :  { %1767 = vmatmul.mubr.f32.vlgmr.msra.gmra.mxu0 %v985_v26 }
 0x545   :  { %1810 = vmatpush3.msra.mxu0 %v2176_v51  ;;  %1811 = vmatprep.mubr.msk.f32.mxu0 %vm1900_vm2, %v1899_v0 }
 0x604   :  { %v1068_v27 = vpop.f32.mrf.mxu0 }
 0x605   :  { %v1072_v28 = vmul.f32 0.001953125, %v1068_v27 }
 0x606   :  { %v1768_v61 = vpop.f32.mrf.mxu0 }
 0x607   :  { %1772 = vmatmul.mubr.msk.f32.vlgmr.msra.gmra.mxu1 %vm436_vm3, %v1072_v28 }
 0x608   :  { %1775 = vmatpush3.msra.mxu1 %v2029_v6  ;;  %1806 = vmatprep.mubr.msk.f32.mxu1 %vm1900_vm2, %v1899_v0 }
 0x609   :  { %1776 = vmatprep.subr.mxu1 %v1899_v0 }
 0x60a   :  { %1777 = vmatpush3.msra.mxu1 %v2037_v7 }
 0x60b   :  { %1778 = vmatprep.subr.mxu1 %v1899_v0 }
 0x60c   :  { %1779 = vmatpush3.msra.mxu1 %v2046_v8 }
 0x60d   :  { %1780 = vmatprep.subr.mxu1 %v1899_v0 }
 0x60e   :  { %1781 = vmatpush3.msra.mxu1 %v2055_v9 }
 0x60f   :  { %1782 = vmatprep.subr.mxu1 %v1899_v0 }
 0x610   :  { %1783 = vmatpush3.msra.mxu1 %v2064_v10 }
 0x611   :  { %1784 = vmatprep.subr.mxu1 %v1899_v0 }
 0x612   :  { %1785 = vmatpush3.msra.mxu1 %v2073_v11 }
 0x613   :  { %1786 = vmatprep.subr.mxu1 %v1899_v0 }
 0x614   :  { %1787 = vmatpush3.msra.mxu1 %v2082_v12 }
 0x615   :  { %1788 = vmatprep.subr.mxu1 %v1899_v0 }
 0x616   :  { %1789 = vmatpush3.msra.mxu1 %v2091_v13 }
 0x617   :  { %1790 = vmatprep.subr.mxu1 %v1899_v0 }
 0x618   :  { %1791 = vmatpush3.msra.mxu1 %v2100_v14 }
 0x619   :  { %1792 = vmatprep.subr.mxu1 %v1899_v0 }
 0x61a   :  { %1793 = vmatpush3.msra.mxu1 %v2109_v15 }
 0x61b   :  { %1794 = vmatprep.subr.mxu1 %v1899_v0 }
 0x61c   :  { %1795 = vmatpush3.msra.mxu1 %v2118_v16 }
 0x61d   :  { %1796 = vmatprep.subr.mxu1 %v1899_v0 }
 0x61e   :  { %1797 = vmatpush3.msra.mxu1 %v2127_v17 }
 0x61f   :  { %1798 = vmatprep.subr.mxu1 %v1899_v0 }
 0x620   :  { %1799 = vmatpush3.msra.mxu1 %v2136_v18 }
 0x621   :  { %1800 = vmatprep.subr.mxu1 %v1899_v0 }
 0x622   :  { %1801 = vmatpush3.msra.mxu1 %v2145_v19 }
 0x623   :  { %1802 = vmatprep.subr.mxu1 %v1899_v0 }
 0x624   :  { %1803 = vmatpush3.msra.mxu1 %v2154_v20 }
 0x625   :  { %1804 = vmatprep.subr.mxu1 %v1899_v0 }
 0x626   :  { %1805 = vmatpush3.msra.mxu1 %v2163_v21 }
 0x6c7   :  { %v1143_v6 = vpop.f32.mrf.mxu1 }
 0x6c8   :  { %v1150_v7 = vrot.slane %v1143_v6, %v2189_v57 }
 0x6c9   :  { %v1773_v8 = vpop.f32.mrf.mxu1 }
 0x6ca   :  { %v1151_v9 = vsub.f32 %v957_v54, %v1150_v7  ;;  %v1152_v10 = vsub.f32 %v962_v49, %v1150_v7  ;;  %v1153_v11 = vsub.f32 %v967_v55, %v1150_v7  ;;  %v1154_v12 = vsub.f32 %v972_v3, %v1150_v7  ;;  %v1828_v54 = vld [vmem:[%s2335_s0 + $0x18] sm:$0xff] }
 0x6cc   :  { %v1155_v13 = vmul.f32 %v1151_v9, %v1151_v9  ;;  %v1156_v14 = vmul.f32 %v1152_v10, %v1152_v10  ;;  %v1157_v15 = vmul.f32 %v1153_v11, %v1153_v11  ;;  %v1158_v17 = vmul.f32 %v1154_v12, %v1154_v12 }
 0x6ce   :  { %v1159_v16 = vadd.f32 %v1156_v14, %v1155_v13 }
 0x6d0   :  { %v1160_v18 = vadd.f32 %v1159_v16, %v1157_v15 }
 0x6d2   :  { %v1161_v19 = vadd.f32 %v1160_v18, %v1158_v17 }
 0x6d4   :  { %v1162_v20 = vrot.slane %v1161_v19, 4 }
 0x6d6   :  { %v1163_v51 = vadd.f32 %v1162_v20, %v1161_v19 }
 0x6d8   :  { %v1164_v0 = vrot.slane %v1163_v51, 2 }
 0x6da   :  { %v1165_v29 = vadd.f32 %v1164_v0, %v1163_v51 }
 0x6dc   :  { %v1166_v21 = vrot.slane %v1165_v29, 1 }
 0x6de   :  { %v1167_v62 = vadd.f32 %v1166_v21, %v1165_v29 }
 0x6e0   :  { %1807 = vmatmul.mubr.f32.vlgmr.msra.gmra.mxu1 %v1167_v62 }
 0x7a0   :  { %v1234_v30 = vpop.f32.mrf.mxu1 }
 0x7a1   :  { %v1238_v63 = vmul.f32 0.001953125, %v1234_v30 }
 0x7a2   :  { %v1808_v1 = vpop.f32.mrf.mxu1 }
 0x7a3   :  { %v1239_v31 = vadd.f32 1e-05, %v1238_v63 }
 0x7a5   :  { %1823 = vrsqrt.f32 %v1239_v31 }
 0x7b2   :  { %v1824_v33 = vpop.eup %1823 }
 0x7b3   :  { %v1241_v35 = vmul.f32 %v1824_v33, %v975_v32 }
 0x7b5   :  { %v1248_v36 = vsel %vm75_vm1, %v1241_v35, %v1372_v34 }
 0x7b6   :  { %1812 = vmatmul.mubr.msk.f32.vlgmr.msra.gmra.mxu0 %vm436_vm3, %v1248_v36 }
 0x876   :  { %v1318_v37 = vpop.f32.mrf.mxu0 }
 0x877   :  { %v1325_v38 = vrot.slane %v1318_v37, %v2189_v57  ;;  %v1333_v39 = vrot.slane %v1318_v37, %v695_v48  ;;  %v1827_v48 = vld [vmem:[%s2335_s0 + $0x10] sm:$0xff] }
 0x878   :  { %v1813_v40 = vpop.f32.mrf.mxu0 }
 0x879   :  { %v1326_v41 = vmul.f32 %v1325_v38, %v1151_v9  ;;  %v1327_v42 = vmul.f32 %v1325_v38, %v1152_v10  ;;  %v1328_v43 = vmul.f32 %v1325_v38, %v1153_v11  ;;  %v1329_v44 = vmul.f32 %v1325_v38, %v1154_v12 }
 0x87b   :  { %v1334_v45 = vadd.f32 %v1333_v39, %v1326_v41  ;;  %v1335_v46 = vadd.f32 %v1333_v39, %v1327_v42  ;;  %v1336_v47 = vadd.f32 %v1333_v39, %v1328_v43  ;;  %v1337_v49 = vadd.f32 %v1333_v39, %v1329_v44 }
 0x87d   :  { %v1338_v52 = vadd.f32 %v1825_v50, %v1334_v45  ;;  %v1339_v57 = vadd.f32 %v1826_v56, %v1335_v46  ;;  %v1340_v53 = vadd.f32 %v1827_v48, %v1336_v47  ;;  %v1341_v55 = vadd.f32 %v1828_v54, %v1337_v49 }
 0x87f   :  { %v1342_v58 = vmax.f32 %v1338_v52, 0.0  ;;  %v1343_v59 = vmax.f32 %v1339_v57, 0.0  ;;  %v1344_v60 = vmax.f32 %v1340_v53, 0.0  ;;  %v1345_v2 = vmax.f32 %v1341_v55, 0.0 }
 0x881   :  { %1346 = vst [vmem:[#allocation8] sm:$0xff] %v1342_v58  ;;  %1347 = vst [vmem:[#allocation8 + $0x8] sm:$0xff] %v1343_v59 }
 0x882   :  { %1348 = vst [vmem:[#allocation8 + $0x10] sm:$0xff] %v1344_v60  ;;  %1349 = vst [vmem:[#allocation8 + $0x18] sm:$0xff] %v1345_v2 }
 0x883   :  { %1880 = shalt.err (!%p1877_p0)
}
 0x884   :  { %1361 = dma.vmem_to_hbm [thread:$0]  %s1356_s6, 512, %s2344_s9, [#allocation5], %s1896_s12, %s1896_s12, %s1897_s13  }
 0x885   :  { %1893 = dma.done.wait [#allocation5], 512  }
 0x886   :  { %1894 = vsyncadd [#allocation5], 4294966784 }
 0x887   :  { %1365 = vsyncpa [#allocation4], 1 }
 0x888   :  { %1366 = vsyncpa [#allocation7], 1 }
 0x889   :  { %1367 = vsyncpa [#allocation5], 1 }

</bundles_post_ra>
